<compile_context>
chip_gen: v6e
topology: v6e:2x2x1
jax: 0.10.0
libtpu: 0.0.40
codegen_flags: <defaults>
</compile_context>

<pallas_src>
import functools
import math

import numpy as np
import jax
import jax.numpy as jnp
from jax.experimental import pallas as pl
from jax.experimental.pallas import tpu as pltpu


def _modulations_kernel(x_ref, w_ref, b_ref, o_ref, *, scale):
    # x_ref: [B, Cc], w_ref: [Cc, tile], b_ref: [1, tile], o_ref: [B, tile]
    # Fold the EqualLinear scale into the activation tile (one vreg, free VPU op) instead
    # of pre-scaling the 640 KiB weight matrix host-side.
    x = x_ref[...] * scale
    o_ref[...] = (
        jnp.dot(x, w_ref[...], preferred_element_type=jnp.float32) + b_ref[...]
    ).astype(o_ref.dtype)


def prepare_modulation_params(weights, biases, lr_mul=1.0, weights_dtype=None):
    """One-time (init-time) parameter packing; NOT part of the forward hot path.

    weights: [n_mod, C_out, Cc]  (EqualLinear weight = randn(out,in)/lr_mul)
    biases:  [n_mod, C_out]
    Returns (w_stacked [Cc, n_mod*C_out], b_flat [1, n_mod*C_out]).
    The EqualLinear `scale` is intentionally NOT folded here — it is applied to x in-kernel.
    """
    n_mod, C_out, Cc = weights.shape
    w_stacked = jnp.transpose(weights, (2, 0, 1)).reshape(Cc, n_mod * C_out)
    if weights_dtype is not None:
        w_stacked = w_stacked.astype(weights_dtype)  # e.g. jnp.bfloat16 to halve weight DMA
    b_flat = (biases * lr_mul).reshape(1, n_mod * C_out)
    return w_stacked, b_flat


def _pick_n_split(cols):
    """Column split: 2 on multi-TensorCore chips (v7x / megacore), else 1."""
    try:
        d = jax.devices()[0]
        kind = str(getattr(d, "device_kind", "")).lower()
        cores = int(getattr(d, "num_cores", 1))
    except Exception:  # pragma: no cover - defensive
        kind, cores = "", 1
    multi_tc = (cores >= 2) or ("v7" in kind)
    return 2 if (multi_tc and cols % 256 == 0) else 1


@functools.partial(
    jax.jit,
    static_argnames=("n_block", "n_conv_each_block", "scale", "n_split"),
)
def modulations_forward(condition_feature, w_stacked, b_flat, *,
                        n_block, n_conv_each_block, scale, n_split):
    """Hot path: one fused lane-dense matmul [B,Cc] x [Cc, n_mod*C_out] + bias."""
    B = condition_feature.shape[0]
    Cc, cols = w_stacked.shape
    n_mod = n_block * n_conv_each_block
    C_out = cols // n_mod

    x = condition_feature.reshape(B, Cc)
    tile = cols // n_split

    itemsize = lambda a: a.dtype.itemsize
    cost = pl.CostEstimate(
        flops=2 * B * Cc * cols,
        transcendentals=0,
        bytes_accessed=(x.size * itemsize(x)
                        + w_stacked.size * itemsize(w_stacked)
                        + b_flat.size * itemsize(b_flat)
                        + B * cols * itemsize(x)),
    )

    out = pl.pallas_call(
        functools.partial(_modulations_kernel, scale=scale),
        out_shape=jax.ShapeDtypeStruct((B, cols), x.dtype),
        grid_spec=pltpu.PrefetchScalarGridSpec(
            num_scalar_prefetch=0,
            grid=(n_split,),
            in_specs=[
                pl.BlockSpec((B, Cc), lambda i: (0, 0)),       # condition features (shared)
                pl.BlockSpec((Cc, tile), lambda i: (0, i)),    # stacked weights
                pl.BlockSpec((1, tile), lambda i: (0, i)),     # stacked biases
            ],
            out_specs=pl.BlockSpec((B, tile), lambda i: (0, i)),
        ),
        compiler_params=pltpu.CompilerParams(
            dimension_semantics=("parallel",)),
        cost_estimate=cost,
    )(x, w_stacked, b_flat)

    # Lane-dense [B, n_mod*C_out] -> [n_block, n_conv_each_block, B, 1, C_out, 1, 1]
    # (10 KiB reorder, done here rather than via a <128-lane masked store in-kernel).
    out = out.reshape(B, n_mod, C_out)
    out = jnp.transpose(out, (1, 0, 2))
    return out.reshape(n_block, n_conv_each_block, B, 1, C_out, 1, 1)


def modulations_pallas(condition_feature, weights, biases,
                       n_block, n_conv_each_block, lr_mul=1.0):
    """Convenience end-to-end call (packs params, then runs the jitted forward)."""
    Cc = condition_feature.shape[1]
    scale = (1.0 / math.sqrt(Cc)) * lr_mul
    w_stacked, b_flat = prepare_modulation_params(weights, biases, lr_mul=lr_mul)
    n_split = _pick_n_split(w_stacked.shape[1])
    return modulations_forward(condition_feature, w_stacked, b_flat,
                               n_block=n_block, n_conv_each_block=n_conv_each_block,
                               scale=float(scale), n_split=n_split)


def modulations_reference(condition_feature, weights, biases,
                          n_block, n_conv_each_block, lr_mul=1.0):
    """Plain-JAX reference mirroring the PyTorch module op-for-op."""
    B, Cc, _, _ = condition_feature.shape
    n_mod, C_out, _ = weights.shape
    scale = (1.0 / math.sqrt(Cc)) * lr_mul
    x = condition_feature.reshape(B, Cc)
    outs = []
    for m in range(n_mod):
        o = x @ (weights[m] * scale).T + biases[m] * lr_mul       # EqualLinear.forward
        outs.append(o.reshape(1, B, 1, C_out, 1, 1))
    out = jnp.concatenate(outs, axis=0)
    return out.reshape(n_block, n_conv_each_block, B, 1, C_out, 1, 1)


if __name__ == "__main__":
    # Module defaults: n_block=10, n_conv_each_block=2, conv_index='128' -> 128 condition
    # channels, sr_in_channel=64.  Batch = 2 (training-style input).
    n_block, n_conv_each_block = 10, 2
    Cc, C_out = 128, 64
    B = 2
    n_mod = n_block * n_conv_each_block

    key = jax.random.PRNGKey(0)
    k1, k2 = jax.random.split(key)

    condition_feature = jax.random.normal(k1, (B, Cc, 1, 1), jnp.float32)
    # EqualLinear params: weight = randn(out, in) / lr_mul (lr_mul=1),
    # bias = zeros(out).fill_(bias_init=1).  initialize_weights leaves them unchanged.
    weights = jax.random.normal(k2, (n_mod, C_out, Cc), jnp.float32)
    biases = jnp.ones((n_mod, C_out), jnp.float32)

    # Init-time packing (cached across forward calls in real use).
    lr_mul = 1.0
    scale = (1.0 / math.sqrt(Cc)) * lr_mul
    w_stacked, b_flat = prepare_modulation_params(weights, biases, lr_mul=lr_mul)
    n_split = _pick_n_split(w_stacked.shape[1])

    out = modulations_forward(condition_feature, w_stacked, b_flat,
                              n_block=n_block, n_conv_each_block=n_conv_each_block,
                              scale=scale, n_split=n_split)
    out = jax.block_until_ready(out)

    ref = modulations_reference(condition_feature, weights, biases,
                                n_block, n_conv_each_block, lr_mul=lr_mul)
    assert out.shape == ref.shape == (n_block, n_conv_each_block, B, 1, C_out, 1, 1)
    if not np.allclose(np.asarray(out), np.asarray(ref), atol=1e-4, rtol=1e-4):
        err = float(jnp.max(jnp.abs(out - ref)))
        raise AssertionError(f"Pallas output mismatch vs reference, max abs err={err}")

    print("KERNEL_OK")
</pallas_src>

<mosaic_0001>
module attributes {stable_mosaic.version = 11 : i64} {
  func.func @_modulations_kernel(%arg0: i32, %arg1: memref<2x128xf32, #tpu.memory_space<vmem>>, %arg2: memref<128x1280xf32, #tpu.memory_space<vmem>>, %arg3: memref<1x1280xf32, #tpu.memory_space<vmem>>, %arg4: memref<2x1280xf32, #tpu.memory_space<vmem>>) attributes {dimension_semantics = [#tpu.dimension_semantics<parallel>], iteration_bounds = array<i64: 1>, scalar_prefetch = 0 : i64, scratch_operands = 0 : i64, tpu.core_type = #tpu.core_type<tc>, window_params = [{pipeline_mode = #tpu.pipeline_mode<synchronous>, transform_indices = @transform_0, window_bounds = array<i64: 2, 128>}, {transform_indices = @transform_1, window_bounds = array<i64: 128, 1280>}, {transform_indices = @transform_2, window_bounds = array<i64: 1, 1280>}, {transform_indices = @transform_3, window_bounds = array<i64: 2, 1280>}]} {
    %c0 = arith.constant 0 : index
    %c0_0 = arith.constant 0 : index
    %0 = vector.load %arg1[%c0, %c0_0] : memref<2x128xf32, #tpu.memory_space<vmem>>, vector<2x128xf32>
    %cst = arith.constant 0.0883883461 : f32
    %1 = vector.broadcast %cst : f32 to vector<2x128xf32>
    %2 = arith.mulf %0, %1 : vector<2x128xf32>
    %c0_1 = arith.constant 0 : index
    %c0_2 = arith.constant 0 : index
    %3 = vector.load %arg2[%c0_1, %c0_2] : memref<128x1280xf32, #tpu.memory_space<vmem>>, vector<128x1280xf32>
    %cst_3 = arith.constant dense<0.000000e+00> : vector<2x1280xf32>
    %4 = tpu.matmul %2, %3, %cst_3 {dimension_numbers = #tpu.dot_dimension_numbers<[1], [0], [0], [1], [0, 0, 1, 1], [], []>} : vector<2x128xf32>, vector<128x1280xf32>, vector<2x1280xf32> -> vector<2x1280xf32>
    %c0_4 = arith.constant 0 : index
    %c0_5 = arith.constant 0 : index
    %5 = vector.load %arg3[%c0_4, %c0_5] : memref<1x1280xf32, #tpu.memory_space<vmem>>, vector<1x1280xf32>
    %6 = vector.broadcast %5 : vector<1x1280xf32> to vector<2x1280xf32>
    %7 = arith.addf %4, %6 : vector<2x1280xf32>
    %c0_6 = arith.constant 0 : index
    %c0_7 = arith.constant 0 : index
    %8 = vector.load %arg4[%c0_6, %c0_7] : memref<2x1280xf32, #tpu.memory_space<vmem>>, vector<2x1280xf32>
    tpu.vector_store %arg4[%c0_6, %c0_7], %7 {strides = array<i32>} : memref<2x1280xf32, #tpu.memory_space<vmem>>, vector<2x1280xf32>,
    return
  }
  func.func @transform_0(%arg0: i32) -> (i32, i32) {
    %c0_i32 = arith.constant 0 : i32
    %c0_i32_0 = arith.constant 0 : i32
    %c0_i32_1 = arith.constant 0 : i32
    return %c0_i32, %c0_i32_0 : i32, i32
  }
  func.func @transform_1(%arg0: i32) -> (i32, i32) {
    %c0_i32 = arith.constant 0 : i32
    %c0_i32_0 = arith.constant 0 : i32
    return %c0_i32, %arg0 : i32, i32
  }
  func.func @transform_2(%arg0: i32) -> (i32, i32) {
    %c0_i32 = arith.constant 0 : i32
    %c0_i32_0 = arith.constant 0 : i32
    return %c0_i32, %arg0 : i32, i32
  }
  func.func @transform_3(%arg0: i32) -> (i32, i32) {
    %c0_i32 = arith.constant 0 : i32
    %c0_i32_0 = arith.constant 0 : i32
    return %c0_i32, %arg0 : i32, i32
  }
}

</mosaic_0001>

<bundles_post_ra>
// kernel: modulations_forward.1
= control target key start
LH: loop header
LB: loop body
LE: loop exit
PB: predicated region body
PF: predicated region fallthrough
CT: control target
= control target key end

     0   :  { %8 = vsyncpa [#allocation3], 0  ;;  %s815_s0 = inlined_call_operand.hbm [shape: f32[2,128], index: 0, kind: input, shape index: {}]   ;;  %s816_s1 = inlined_call_operand.hbm [shape: f32[128,1280], index: 1, kind: input, shape index: {}]   ;;  %s817_s2 = inlined_call_operand.hbm [shape: f32[1,1280], index: 2, kind: input, shape index: {}]   ;;  %s818_s3 = inlined_call_operand.vmem [shape: f32[2,1280], index: 3, kind: output, shape index: {}]  }
   0x1   :  { %9 = vsyncpa [#allocation5], 0  ;;  %s758_s12 = smov [#allocation4]  }
   0x2   :  { %s25_s13 = sshll.u32 %s758_s12, 4  ;;  %s26_s13 = int_to_ptr.vmem [resolvable:$true] %s25_s13 }
   0x3   :  { %s702_s14 = scalar_lea.vmem %s26_s13, 20480  ;;  %p707_p1 = scmp.lt.s32.totalorder %s26_s13, %s26_s13 }
   0x4   :  { %p703_p0 = scmp.ne.s32.totalorder %s26_s13, %s702_s14  ;;  %p708_p2 = scmp.lt.s32.totalorder %s702_s14, %s702_s14 }
   0x6   :  { %p709_p3 = por %p708_p2, %p707_p1 }
   0x8   :  { %p710_p4 = pnand %p709_p3, %p703_p0 }
   0xa   :  { %713 = shalt.err (!%p710_p4)
}
   0xb   :  { %s759_s15 = smov 1280   ;;  %s760_s16 = smov 80  }
   0xc   :  { %31 = dma.hbm_to_vmem [thread:$0]  %s816_s1, 20480, %s26_s13, [#allocation5], %s759_s15, %s759_s15, %s760_s16  }
   0xd   :  { %s761_s19 = smov [#allocation2]   ;;  %s762_s21 = smov [#allocation6]  }
   0xe   :  { %s16_s20 = sshll.u32 %s761_s19, 4  ;;  %s38_s22 = sshll.u32 %s762_s21, 4  ;;  %s17_s20 = int_to_ptr.vmem [resolvable:$true] %s16_s20  ;;  %s39_s22 = int_to_ptr.vmem [resolvable:$true] %s38_s22 }
   0xf   :  { %s722_s23 = scalar_lea.vmem %s17_s20, 32  ;;  %p727_p6 = scmp.lt.s32.totalorder %s17_s20, %s17_s20 }
  0x10   :  { %p723_p5 = scmp.ne.s32.totalorder %s17_s20, %s722_s23  ;;  %p728_p7 = scmp.lt.s32.totalorder %s722_s23, %s722_s23 }
  0x12   :  { %p729_p8 = por %p728_p7, %p727_p6 }
  0x14   :  { %p730_p9 = pnand %p729_p8, %p723_p5 }
  0x16   :  { %733 = shalt.err (!%p730_p9)
}
  0x17   :  { %19 = dma.hbm_to_vmem [thread:$0]  %s815_s0, 32, %s17_s20, [#allocation3]  }
  0x18   :  { %s742_s26 = scalar_lea.vmem %s39_s22, 160  ;;  %p747_p11 = scmp.lt.s32.totalorder %s39_s22, %s39_s22 }
  0x19   :  { %p743_p10 = scmp.ne.s32.totalorder %s39_s22, %s742_s26  ;;  %p748_p12 = scmp.lt.s32.totalorder %s742_s26, %s742_s26 }
  0x1b   :  { %p749_p13 = por %p748_p12, %p747_p11 }
  0x1d   :  { %p750_p0 = pnand %p749_p13, %p743_p10 }
  0x1f   :  { %753 = shalt.err (!%p750_p0)
}
  0x20   :  { %41 = dma.hbm_to_vmem [thread:$0]  %s817_s2, 160, %s39_s22, [#allocation5]  }
  0x21   :  { %754 = dma.done.wait [#allocation3], 32  }
  0x22   :  { %755 = vsyncadd [#allocation3], 4294967264 }
  0x23   :  { %756 = dma.done.wait [#allocation5], 20640  }
  0x24   :  { %757 = vsyncadd [#allocation5], 4294946656  ;;  %v763_v0 = vmov 0.0   ;;  %v204_v1 = vld [vmem:[#allocation4 + $0x4b8] sm:$0xff]  ;;  %v206_v2 = vld [vmem:[#allocation4 + $0x4c8] sm:$0xff] }
  0x25   :  { %331 = vmatprep.mubr.f32.mxu0 %v763_v0  ;;  %402 = vmatprep.mubr.f32.mxu1 %v763_v0  ;;  %v203_v3 = vld [vmem:[#allocation4 + $0x4b0] sm:$0xff]  ;;  %v205_v4 = vld [vmem:[#allocation4 + $0x4c0] sm:$0xff]  ;;  %v194_v5 = vld [vmem:[#allocation4 + $0x468] sm:$0xff] }
  0x26   :  { %267 = vmatprep.subr.mxu0 %v204_v1  ;;  %338 = vmatprep.subr.mxu1 %v206_v2  ;;  %v196_v6 = vld [vmem:[#allocation4 + $0x478] sm:$0xff]  ;;  %v193_v7 = vld [vmem:[#allocation4 + $0x460] sm:$0xff]  ;;  %v195_v8 = vld [vmem:[#allocation4 + $0x470] sm:$0xff] }
  0x27   :  { %268 = vmatpush1.msra.mxu0 %v203_v3  ;;  %339 = vmatpush1.msra.mxu1 %v205_v4  ;;  %v184_v9 = vld [vmem:[#allocation4 + $0x418] sm:$0xff]  ;;  %v186_v10 = vld [vmem:[#allocation4 + $0x428] sm:$0xff]  ;;  %v183_v11 = vld [vmem:[#allocation4 + $0x410] sm:$0xff] }
  0x28   :  { %269 = vmatprep.subr.mxu0 %v194_v5  ;;  %340 = vmatprep.subr.mxu1 %v196_v6  ;;  %v185_v12 = vld [vmem:[#allocation4 + $0x420] sm:$0xff]  ;;  %v174_v13 = vld [vmem:[#allocation4 + $0x3c8] sm:$0xff]  ;;  %v176_v14 = vld [vmem:[#allocation4 + $0x3d8] sm:$0xff] }
  0x29   :  { %270 = vmatpush1.msra.mxu0 %v193_v7  ;;  %341 = vmatpush1.msra.mxu1 %v195_v8  ;;  %v173_v15 = vld [vmem:[#allocation4 + $0x3c0] sm:$0xff]  ;;  %v175_v16 = vld [vmem:[#allocation4 + $0x3d0] sm:$0xff]  ;;  %v164_v17 = vld [vmem:[#allocation4 + $0x378] sm:$0xff] }
  0x2a   :  { %271 = vmatprep.subr.mxu0 %v184_v9  ;;  %342 = vmatprep.subr.mxu1 %v186_v10  ;;  %v166_v18 = vld [vmem:[#allocation4 + $0x388] sm:$0xff]  ;;  %v163_v19 = vld [vmem:[#allocation4 + $0x370] sm:$0xff]  ;;  %v165_v20 = vld [vmem:[#allocation4 + $0x380] sm:$0xff] }
  0x2b   :  { %272 = vmatpush1.msra.mxu0 %v183_v11  ;;  %343 = vmatpush1.msra.mxu1 %v185_v12  ;;  %v154_v21 = vld [vmem:[#allocation4 + $0x328] sm:$0xff]  ;;  %v156_v22 = vld [vmem:[#allocation4 + $0x338] sm:$0xff]  ;;  %v153_v23 = vld [vmem:[#allocation4 + $0x320] sm:$0xff] }
  0x2c   :  { %273 = vmatprep.subr.mxu0 %v174_v13  ;;  %344 = vmatprep.subr.mxu1 %v176_v14  ;;  %v155_v24 = vld [vmem:[#allocation4 + $0x330] sm:$0xff]  ;;  %v144_v25 = vld [vmem:[#allocation4 + $0x2d8] sm:$0xff]  ;;  %v146_v26 = vld [vmem:[#allocation4 + $0x2e8] sm:$0xff] }
  0x2d   :  { %274 = vmatpush1.msra.mxu0 %v173_v15  ;;  %345 = vmatpush1.msra.mxu1 %v175_v16  ;;  %v143_v27 = vld [vmem:[#allocation4 + $0x2d0] sm:$0xff]  ;;  %v145_v28 = vld [vmem:[#allocation4 + $0x2e0] sm:$0xff]  ;;  %v134_v29 = vld [vmem:[#allocation4 + $0x288] sm:$0xff] }
  0x2e   :  { %275 = vmatprep.subr.mxu0 %v164_v17  ;;  %346 = vmatprep.subr.mxu1 %v166_v18  ;;  %v136_v30 = vld [vmem:[#allocation4 + $0x298] sm:$0xff]  ;;  %v133_v31 = vld [vmem:[#allocation4 + $0x280] sm:$0xff]  ;;  %v135_v32 = vld [vmem:[#allocation4 + $0x290] sm:$0xff] }
  0x2f   :  { %276 = vmatpush1.msra.mxu0 %v163_v19  ;;  %347 = vmatpush1.msra.mxu1 %v165_v20  ;;  %v124_v33 = vld [vmem:[#allocation4 + $0x238] sm:$0xff]  ;;  %v126_v34 = vld [vmem:[#allocation4 + $0x248] sm:$0xff]  ;;  %v123_v35 = vld [vmem:[#allocation4 + $0x230] sm:$0xff] }
  0x30   :  { %277 = vmatprep.subr.mxu0 %v154_v21  ;;  %348 = vmatprep.subr.mxu1 %v156_v22  ;;  %v125_v36 = vld [vmem:[#allocation4 + $0x240] sm:$0xff]  ;;  %v114_v37 = vld [vmem:[#allocation4 + $0x1e8] sm:$0xff]  ;;  %v116_v38 = vld [vmem:[#allocation4 + $0x1f8] sm:$0xff] }
  0x31   :  { %278 = vmatpush1.msra.mxu0 %v153_v23  ;;  %349 = vmatpush1.msra.mxu1 %v155_v24  ;;  %v113_v39 = vld [vmem:[#allocation4 + $0x1e0] sm:$0xff]  ;;  %v115_v40 = vld [vmem:[#allocation4 + $0x1f0] sm:$0xff]  ;;  %v104_v41 = vld [vmem:[#allocation4 + $0x198] sm:$0xff] }
  0x32   :  { %279 = vmatprep.subr.mxu0 %v144_v25  ;;  %350 = vmatprep.subr.mxu1 %v146_v26  ;;  %v106_v42 = vld [vmem:[#allocation4 + $0x1a8] sm:$0xff]  ;;  %v103_v43 = vld [vmem:[#allocation4 + $0x190] sm:$0xff]  ;;  %v105_v44 = vld [vmem:[#allocation4 + $0x1a0] sm:$0xff] }
  0x33   :  { %280 = vmatpush1.msra.mxu0 %v143_v27  ;;  %351 = vmatpush1.msra.mxu1 %v145_v28  ;;  %v94_v45 = vld [vmem:[#allocation4 + $0x148] sm:$0xff]  ;;  %v96_v46 = vld [vmem:[#allocation4 + $0x158] sm:$0xff]  ;;  %v93_v47 = vld [vmem:[#allocation4 + $0x140] sm:$0xff] }
  0x34   :  { %281 = vmatprep.subr.mxu0 %v134_v29  ;;  %352 = vmatprep.subr.mxu1 %v136_v30  ;;  %v95_v48 = vld [vmem:[#allocation4 + $0x150] sm:$0xff]  ;;  %v84_v49 = vld [vmem:[#allocation4 + $0xf8] sm:$0xff]  ;;  %v86_v50 = vld [vmem:[#allocation4 + $0x108] sm:$0xff] }
  0x35   :  { %282 = vmatpush1.msra.mxu0 %v133_v31  ;;  %353 = vmatpush1.msra.mxu1 %v135_v32  ;;  %v83_v51 = vld [vmem:[#allocation4 + $0xf0] sm:$0xff]  ;;  %v85_v52 = vld [vmem:[#allocation4 + $0x100] sm:$0xff]  ;;  %v74_v53 = vld [vmem:[#allocation4 + $0xa8] sm:$0xff] }
  0x36   :  { %283 = vmatprep.subr.mxu0 %v124_v33  ;;  %354 = vmatprep.subr.mxu1 %v126_v34  ;;  %v76_v54 = vld [vmem:[#allocation4 + $0xb8] sm:$0xff]  ;;  %v73_v55 = vld [vmem:[#allocation4 + $0xa0] sm:$0xff]  ;;  %v75_v56 = vld [vmem:[#allocation4 + $0xb0] sm:$0xff] }
  0x37   :  { %284 = vmatpush1.msra.mxu0 %v123_v35  ;;  %355 = vmatpush1.msra.mxu1 %v125_v36  ;;  %v64_v57 = vld [vmem:[#allocation4 + $0x58] sm:$0xff]  ;;  %v66_v58 = vld [vmem:[#allocation4 + $0x68] sm:$0xff]  ;;  %v63_v60 = vld [vmem:[#allocation4 + $0x50] sm:$0xff] }
  0x38   :  { %285 = vmatprep.subr.mxu0 %v114_v37  ;;  %356 = vmatprep.subr.mxu1 %v116_v38  ;;  %v51_v59 = vld [vmem:[#allocation2] sm:$0x3]  ;;  %v65_v61 = vld [vmem:[#allocation4 + $0x60] sm:$0xff]  ;;  %v54_v62 = vld [vmem:[#allocation4 + $0x8] sm:$0xff] }
  0x39   :  { %286 = vmatpush1.msra.mxu0 %v113_v39  ;;  %357 = vmatpush1.msra.mxu1 %v115_v40  ;;  %v56_v63 = vld [vmem:[#allocation4 + $0x18] sm:$0xff]  ;;  %v53_v1 = vld [vmem:[#allocation4] sm:$0xff]  ;;  %v55_v2 = vld [vmem:[#allocation4 + $0x10] sm:$0xff]  ;;  %v796_v3 = vmul.f32 0.088388346, %v51_v59 }
  0x3a   :  { %287 = vmatprep.subr.mxu0 %v104_v41  ;;  %358 = vmatprep.subr.mxu1 %v106_v42  ;;  %v208_v4 = vld [vmem:[#allocation4 + $0x4d8] sm:$0xff]  ;;  %v210_v5 = vld [vmem:[#allocation4 + $0x4e8] sm:$0xff]  ;;  %v207_v6 = vld [vmem:[#allocation4 + $0x4d0] sm:$0xff] }
  0x3b   :  { %288 = vmatpush1.msra.mxu0 %v103_v43  ;;  %359 = vmatpush1.msra.mxu1 %v105_v44  ;;  %v209_v7 = vld [vmem:[#allocation4 + $0x4e0] sm:$0xff]  ;;  %v198_v8 = vld [vmem:[#allocation4 + $0x488] sm:$0xff]  ;;  %v200_v9 = vld [vmem:[#allocation4 + $0x498] sm:$0xff] }
  0x3c   :  { %289 = vmatprep.subr.mxu0 %v94_v45  ;;  %360 = vmatprep.subr.mxu1 %v96_v46  ;;  %v197_v10 = vld [vmem:[#allocation4 + $0x480] sm:$0xff]  ;;  %v199_v11 = vld [vmem:[#allocation4 + $0x490] sm:$0xff]  ;;  %v188_v12 = vld [vmem:[#allocation4 + $0x438] sm:$0xff] }
  0x3d   :  { %290 = vmatpush1.msra.mxu0 %v93_v47  ;;  %361 = vmatpush1.msra.mxu1 %v95_v48  ;;  %v190_v13 = vld [vmem:[#allocation4 + $0x448] sm:$0xff]  ;;  %v187_v14 = vld [vmem:[#allocation4 + $0x430] sm:$0xff]  ;;  %v189_v15 = vld [vmem:[#allocation4 + $0x440] sm:$0xff] }
  0x3e   :  { %291 = vmatprep.subr.mxu0 %v84_v49  ;;  %362 = vmatprep.subr.mxu1 %v86_v50  ;;  %v178_v16 = vld [vmem:[#allocation4 + $0x3e8] sm:$0xff]  ;;  %v180_v17 = vld [vmem:[#allocation4 + $0x3f8] sm:$0xff]  ;;  %v177_v18 = vld [vmem:[#allocation4 + $0x3e0] sm:$0xff] }
  0x3f   :  { %292 = vmatpush1.msra.mxu0 %v83_v51  ;;  %363 = vmatpush1.msra.mxu1 %v85_v52  ;;  %v179_v19 = vld [vmem:[#allocation4 + $0x3f0] sm:$0xff]  ;;  %v168_v20 = vld [vmem:[#allocation4 + $0x398] sm:$0xff]  ;;  %v170_v21 = vld [vmem:[#allocation4 + $0x3a8] sm:$0xff] }
  0x40   :  { %293 = vmatprep.subr.mxu0 %v74_v53  ;;  %364 = vmatprep.subr.mxu1 %v76_v54  ;;  %v167_v22 = vld [vmem:[#allocation4 + $0x390] sm:$0xff]  ;;  %v169_v23 = vld [vmem:[#allocation4 + $0x3a0] sm:$0xff]  ;;  %v158_v24 = vld [vmem:[#allocation4 + $0x348] sm:$0xff] }
  0x41   :  { %294 = vmatpush1.msra.mxu0 %v73_v55  ;;  %365 = vmatpush1.msra.mxu1 %v75_v56  ;;  %v160_v25 = vld [vmem:[#allocation4 + $0x358] sm:$0xff]  ;;  %v157_v26 = vld [vmem:[#allocation4 + $0x340] sm:$0xff]  ;;  %v159_v27 = vld [vmem:[#allocation4 + $0x350] sm:$0xff] }
  0x42   :  { %295 = vmatprep.subr.mxu0 %v64_v57  ;;  %366 = vmatprep.subr.mxu1 %v66_v58  ;;  %v148_v28 = vld [vmem:[#allocation4 + $0x2f8] sm:$0xff]  ;;  %v150_v29 = vld [vmem:[#allocation4 + $0x308] sm:$0xff]  ;;  %v147_v30 = vld [vmem:[#allocation4 + $0x2f0] sm:$0xff] }
  0x43   :  { %296 = vmatpush1.msra.mxu0 %v63_v60  ;;  %367 = vmatpush1.msra.mxu1 %v65_v61  ;;  %v149_v31 = vld [vmem:[#allocation4 + $0x300] sm:$0xff]  ;;  %v138_v32 = vld [vmem:[#allocation4 + $0x2a8] sm:$0xff]  ;;  %v140_v33 = vld [vmem:[#allocation4 + $0x2b8] sm:$0xff] }
  0x44   :  { %297 = vmatprep.subr.mxu0 %v54_v62  ;;  %368 = vmatprep.subr.mxu1 %v56_v63  ;;  %v137_v34 = vld [vmem:[#allocation4 + $0x2a0] sm:$0xff]  ;;  %v139_v35 = vld [vmem:[#allocation4 + $0x2b0] sm:$0xff]  ;;  %v128_v36 = vld [vmem:[#allocation4 + $0x258] sm:$0xff] }
  0x45   :  { %298 = vmatpush1.msra.mxu0 %v53_v1  ;;  %369 = vmatpush1.msra.mxu1 %v55_v2  ;;  %v130_v37 = vld [vmem:[#allocation4 + $0x268] sm:$0xff]  ;;  %v127_v38 = vld [vmem:[#allocation4 + $0x250] sm:$0xff]  ;;  %v129_v39 = vld [vmem:[#allocation4 + $0x260] sm:$0xff] }
  0x46   :  { %332 = vmatmul.mubr.f32.vlgmr.msra.gmra.mxu0 %v796_v3  ;;  %403 = vmatmul.mubr.f32.vlgmr.msra.gmra.mxu1 %v796_v3  ;;  %v118_v40 = vld [vmem:[#allocation4 + $0x208] sm:$0xff]  ;;  %v120_v41 = vld [vmem:[#allocation4 + $0x218] sm:$0xff]  ;;  %v117_v42 = vld [vmem:[#allocation4 + $0x200] sm:$0xff] }
  0x47   :  { %409 = vmatprep.subr.mxu0 %v208_v4  ;;  %480 = vmatprep.subr.mxu1 %v210_v5  ;;  %v119_v43 = vld [vmem:[#allocation4 + $0x210] sm:$0xff]  ;;  %v108_v44 = vld [vmem:[#allocation4 + $0x1b8] sm:$0xff]  ;;  %v110_v45 = vld [vmem:[#allocation4 + $0x1c8] sm:$0xff] }
  0x48   :  { %410 = vmatpush1.msra.mxu0 %v207_v6  ;;  %481 = vmatpush1.msra.mxu1 %v209_v7  ;;  %v107_v46 = vld [vmem:[#allocation4 + $0x1b0] sm:$0xff]  ;;  %v109_v47 = vld [vmem:[#allocation4 + $0x1c0] sm:$0xff]  ;;  %v98_v48 = vld [vmem:[#allocation4 + $0x168] sm:$0xff] }
  0x49   :  { %411 = vmatprep.subr.mxu0 %v198_v8  ;;  %482 = vmatprep.subr.mxu1 %v200_v9  ;;  %v100_v49 = vld [vmem:[#allocation4 + $0x178] sm:$0xff]  ;;  %v97_v50 = vld [vmem:[#allocation4 + $0x160] sm:$0xff]  ;;  %v99_v51 = vld [vmem:[#allocation4 + $0x170] sm:$0xff] }
  0x4a   :  { %412 = vmatpush1.msra.mxu0 %v197_v10  ;;  %483 = vmatpush1.msra.mxu1 %v199_v11  ;;  %v88_v52 = vld [vmem:[#allocation4 + $0x118] sm:$0xff]  ;;  %v90_v53 = vld [vmem:[#allocation4 + $0x128] sm:$0xff]  ;;  %v87_v54 = vld [vmem:[#allocation4 + $0x110] sm:$0xff] }
  0x4b   :  { %413 = vmatprep.subr.mxu0 %v188_v12  ;;  %484 = vmatprep.subr.mxu1 %v190_v13  ;;  %v89_v55 = vld [vmem:[#allocation4 + $0x120] sm:$0xff]  ;;  %v78_v56 = vld [vmem:[#allocation4 + $0xc8] sm:$0xff]  ;;  %v80_v57 = vld [vmem:[#allocation4 + $0xd8] sm:$0xff] }
  0x4c   :  { %414 = vmatpush1.msra.mxu0 %v187_v14  ;;  %485 = vmatpush1.msra.mxu1 %v189_v15  ;;  %v77_v58 = vld [vmem:[#allocation4 + $0xc0] sm:$0xff]  ;;  %v79_v59 = vld [vmem:[#allocation4 + $0xd0] sm:$0xff]  ;;  %v68_v60 = vld [vmem:[#allocation4 + $0x78] sm:$0xff] }
  0x4d   :  { %415 = vmatprep.subr.mxu0 %v178_v16  ;;  %486 = vmatprep.subr.mxu1 %v180_v17  ;;  %v70_v61 = vld [vmem:[#allocation4 + $0x88] sm:$0xff]  ;;  %v67_v62 = vld [vmem:[#allocation4 + $0x70] sm:$0xff]  ;;  %v69_v63 = vld [vmem:[#allocation4 + $0x80] sm:$0xff] }
  0x4e   :  { %416 = vmatpush1.msra.mxu0 %v177_v18  ;;  %487 = vmatpush1.msra.mxu1 %v179_v19  ;;  %v58_v1 = vld [vmem:[#allocation4 + $0x28] sm:$0xff]  ;;  %v60_v2 = vld [vmem:[#allocation4 + $0x38] sm:$0xff]  ;;  %v57_v4 = vld [vmem:[#allocation4 + $0x20] sm:$0xff] }
  0x4f   :  { %417 = vmatprep.subr.mxu0 %v168_v20  ;;  %488 = vmatprep.subr.mxu1 %v170_v21  ;;  %v59_v5 = vld [vmem:[#allocation4 + $0x30] sm:$0xff]  ;;  %v212_v6 = vld [vmem:[#allocation4 + $0x4f8] sm:$0xff]  ;;  %v202_v8 = vld [vmem:[#allocation4 + $0x4a8] sm:$0xff] }
  0x50   :  { %418 = vmatpush1.msra.mxu0 %v167_v22  ;;  %489 = vmatpush1.msra.mxu1 %v169_v23  ;;  %v211_v7 = vld [vmem:[#allocation4 + $0x4f0] sm:$0xff]  ;;  %v201_v9 = vld [vmem:[#allocation4 + $0x4a0] sm:$0xff]  ;;  %v192_v10 = vld [vmem:[#allocation4 + $0x458] sm:$0xff] }
  0x51   :  { %419 = vmatprep.subr.mxu0 %v158_v24  ;;  %490 = vmatprep.subr.mxu1 %v160_v25  ;;  %v191_v11 = vld [vmem:[#allocation4 + $0x450] sm:$0xff]  ;;  %v182_v12 = vld [vmem:[#allocation4 + $0x408] sm:$0xff]  ;;  %v181_v13 = vld [vmem:[#allocation4 + $0x400] sm:$0xff] }
  0x52   :  { %420 = vmatpush1.msra.mxu0 %v157_v26  ;;  %491 = vmatpush1.msra.mxu1 %v159_v27  ;;  %v172_v14 = vld [vmem:[#allocation4 + $0x3b8] sm:$0xff]  ;;  %v171_v15 = vld [vmem:[#allocation4 + $0x3b0] sm:$0xff]  ;;  %v162_v16 = vld [vmem:[#allocation4 + $0x368] sm:$0xff] }
  0x53   :  { %421 = vmatprep.subr.mxu0 %v148_v28  ;;  %492 = vmatprep.subr.mxu1 %v150_v29  ;;  %v161_v17 = vld [vmem:[#allocation4 + $0x360] sm:$0xff]  ;;  %v152_v18 = vld [vmem:[#allocation4 + $0x318] sm:$0xff]  ;;  %v142_v19 = vld [vmem:[#allocation4 + $0x2c8] sm:$0xff] }
  0x54   :  { %422 = vmatpush1.msra.mxu0 %v147_v30  ;;  %493 = vmatpush1.msra.mxu1 %v149_v31  ;;  %v141_v20 = vld [vmem:[#allocation4 + $0x2c0] sm:$0xff]  ;;  %v132_v21 = vld [vmem:[#allocation4 + $0x278] sm:$0xff]  ;;  %v131_v22 = vld [vmem:[#allocation4 + $0x270] sm:$0xff] }
  0x55   :  { %423 = vmatprep.subr.mxu0 %v138_v32  ;;  %494 = vmatprep.subr.mxu1 %v140_v33  ;;  %v122_v23 = vld [vmem:[#allocation4 + $0x228] sm:$0xff]  ;;  %v121_v24 = vld [vmem:[#allocation4 + $0x220] sm:$0xff]  ;;  %v112_v25 = vld [vmem:[#allocation4 + $0x1d8] sm:$0xff] }
  0x56   :  { %424 = vmatpush1.msra.mxu0 %v137_v34  ;;  %495 = vmatpush1.msra.mxu1 %v139_v35  ;;  %v111_v26 = vld [vmem:[#allocation4 + $0x1d0] sm:$0xff]  ;;  %v102_v27 = vld [vmem:[#allocation4 + $0x188] sm:$0xff]  ;;  %v101_v28 = vld [vmem:[#allocation4 + $0x180] sm:$0xff] }
  0x57   :  { %425 = vmatprep.subr.mxu0 %v128_v36  ;;  %496 = vmatprep.subr.mxu1 %v130_v37  ;;  %v92_v29 = vld [vmem:[#allocation4 + $0x138] sm:$0xff]  ;;  %v91_v30 = vld [vmem:[#allocation4 + $0x130] sm:$0xff]  ;;  %v82_v31 = vld [vmem:[#allocation4 + $0xe8] sm:$0xff]  ;;  %v217_v37 = vlaneseq }
  0x58   :  { %426 = vmatpush1.msra.mxu0 %v127_v38  ;;  %497 = vmatpush1.msra.mxu1 %v129_v39  ;;  %v81_v32 = vld [vmem:[#allocation4 + $0xe0] sm:$0xff]  ;;  %v72_v33 = vld [vmem:[#allocation4 + $0x98] sm:$0xff]  ;;  %v71_v34 = vld [vmem:[#allocation4 + $0x90] sm:$0xff] }
  0x59   :  { %427 = vmatprep.subr.mxu0 %v118_v40  ;;  %498 = vmatprep.subr.mxu1 %v120_v41  ;;  %v62_v35 = vld [vmem:[#allocation4 + $0x48] sm:$0xff]  ;;  %v61_v36 = vld [vmem:[#allocation4 + $0x40] sm:$0xff]  ;;  %v218_v38 = vshrl.u32 %v217_v37, 7 }
  0x5a   :  { %428 = vmatpush1.msra.mxu0 %v117_v42  ;;  %499 = vmatpush1.msra.mxu1 %v119_v43  ;;  %v213_v41 = vld [vmem:[#allocation6] sm:$0xff]  ;;  %v764_v43 = vmov 1983009808  }
  0x5b   :  { %429 = vmatprep.subr.mxu0 %v108_v44  ;;  %500 = vmatprep.subr.mxu1 %v110_v45  ;;  %v219_v39 = vsub.s32 0, %v218_v38  ;;  %v227_v40 = vsub.s32 2, %v218_v38  ;;  %v223_v42 = vsub.s32 1, %v218_v38  ;;  %v635_v44 = vunpack.c.l.s4 %v764_v43 }
  0x5c   :  { %430 = vmatpush1.msra.mxu0 %v107_v46  ;;  %501 = vmatpush1.msra.mxu1 %v109_v47  ;;  %v231_v45 = vsub.s32 3, %v218_v38 }
  0x5d   :  { %431 = vmatprep.subr.mxu0 %v98_v48  ;;  %502 = vmatprep.subr.mxu1 %v100_v49  ;;  %v220_v46 = vrot.slane %v213_v41, %v219_v39  ;;  %v228_v47 = vrot.slane %v213_v41, %v227_v40  ;;  %v224_v48 = vrot.slane %v213_v41, %v223_v42  ;;  %v636_v49 = vunpack.c.0.s8 %v635_v44 }
  0x5e   :  { %432 = vmatpush1.msra.mxu0 %v97_v50  ;;  %503 = vmatpush1.msra.mxu1 %v99_v51  ;;  %v232_v50 = vrot.slane %v213_v41, %v231_v45 }
  0x5f   :  { %433 = vmatprep.subr.mxu0 %v88_v52  ;;  %504 = vmatprep.subr.mxu1 %v90_v53 }
  0x60   :  { %434 = vmatpush1.msra.mxu0 %v87_v54  ;;  %505 = vmatpush1.msra.mxu1 %v89_v55 }
  0x61   :  { %435 = vmatprep.subr.mxu0 %v78_v56  ;;  %506 = vmatprep.subr.mxu1 %v80_v57  ;;  %v639_v57 = vsub.s32 %v636_v49, %v218_v38 }
  0x62   :  { %436 = vmatpush1.msra.mxu0 %v77_v58  ;;  %507 = vmatpush1.msra.mxu1 %v79_v59 }
  0x63   :  { %437 = vmatprep.subr.mxu0 %v68_v60  ;;  %508 = vmatprep.subr.mxu1 %v70_v61 }
  0x64   :  { %438 = vmatpush1.msra.mxu0 %v67_v62  ;;  %509 = vmatpush1.msra.mxu1 %v69_v63 }
  0x65   :  { %439 = vmatprep.subr.mxu0 %v58_v1  ;;  %510 = vmatprep.subr.mxu1 %v60_v2  ;;  %v235_v1 = vsub.s32 4, %v218_v38  ;;  %v243_v2 = vsub.s32 6, %v218_v38 }
  0x66   :  { %440 = vmatpush1.msra.mxu0 %v57_v4  ;;  %473 = vmatprep.mubr.f32.mxu0 %v763_v0  ;;  %v239_v4 = vsub.s32 5, %v218_v38 }
  0x67   :  { %511 = vmatpush1.msra.mxu1 %v59_v5  ;;  %544 = vmatprep.mubr.f32.mxu1 %v763_v0  ;;  %v247_v5 = vsub.s32 7, %v218_v38 }
  0x68   :  { %474 = vmatmul.mubr.f32.vlgmr.msra.gmra.mxu0 %v796_v3  ;;  %545 = vmatmul.mubr.f32.vlgmr.msra.gmra.mxu1 %v796_v3 }
  0x69   :  { %551 = vmatprep.subr.mxu0 %v212_v6  ;;  %615 = vmatprep.mubr.f32.mxu0 %v763_v0  ;;  %v151_v0 = vld [vmem:[#allocation4 + $0x310] sm:$0xff]  ;;  %v236_v6 = vrot.slane %v213_v41, %v235_v1 }
  0x6a   :  { %552 = vmatpush1.msra.mxu0 %v211_v7  ;;  %v244_v7 = vrot.slane %v213_v41, %v243_v2 }
  0x6b   :  { %553 = vmatprep.subr.mxu0 %v202_v8  ;;  %v240_v8 = vrot.slane %v213_v41, %v239_v4 }
  0x6c   :  { %554 = vmatpush1.msra.mxu0 %v201_v9  ;;  %v248_v9 = vrot.slane %v213_v41, %v247_v5 }
  0x6d   :  { %555 = vmatprep.subr.mxu0 %v192_v10 }
  0x6e   :  { %556 = vmatpush1.msra.mxu0 %v191_v11 }
  0x6f   :  { %557 = vmatprep.subr.mxu0 %v182_v12 }
  0x70   :  { %558 = vmatpush1.msra.mxu0 %v181_v13 }
  0x71   :  { %559 = vmatprep.subr.mxu0 %v172_v14 }
  0x72   :  { %560 = vmatpush1.msra.mxu0 %v171_v15 }
  0x73   :  { %561 = vmatprep.subr.mxu0 %v162_v16 }
  0x74   :  { %562 = vmatpush1.msra.mxu0 %v161_v17 }
  0x75   :  { %563 = vmatprep.subr.mxu0 %v152_v18 }
  0x76   :  { %564 = vmatpush1.msra.mxu0 %v151_v0 }
  0x77   :  { %565 = vmatprep.subr.mxu0 %v142_v19 }
  0x78   :  { %566 = vmatpush1.msra.mxu0 %v141_v20 }
  0x79   :  { %567 = vmatprep.subr.mxu0 %v132_v21 }
  0x7a   :  { %568 = vmatpush1.msra.mxu0 %v131_v22  ;;  %v214_v22 = vld [vmem:[#allocation6 + $0x8] sm:$0x3] }
  0x7b   :  { %569 = vmatprep.subr.mxu0 %v122_v23  ;;  %v252_v23 = vrot.slane %v214_v22, %v219_v39 }
  0x7c   :  { %570 = vmatpush1.msra.mxu0 %v121_v24  ;;  %v256_v24 = vrot.slane %v214_v22, %v223_v42 }
  0x7d   :  { %571 = vmatprep.subr.mxu0 %v112_v25 }
  0x7e   :  { %572 = vmatpush1.msra.mxu0 %v111_v26 }
  0x7f   :  { %573 = vmatprep.subr.mxu0 %v102_v27 }
  0x80   :  { %574 = vmatpush1.msra.mxu0 %v101_v28 }
  0x81   :  { %575 = vmatprep.subr.mxu0 %v92_v29 }
  0x82   :  { %576 = vmatpush1.msra.mxu0 %v91_v30 }
  0x83   :  { %577 = vmatprep.subr.mxu0 %v82_v31 }
  0x84   :  { %578 = vmatpush1.msra.mxu0 %v81_v32 }
  0x85   :  { %579 = vmatprep.subr.mxu0 %v72_v33 }
  0x86   :  { %580 = vmatpush1.msra.mxu0 %v71_v34 }
  0x87   :  { %581 = vmatprep.subr.mxu0 %v62_v35 }
  0x88   :  { %582 = vmatpush1.msra.mxu0 %v61_v36 }
  0x89   :  { %616 = vmatmul.mubr.f32.vlgmr.msra.gmra.mxu0 %v796_v3 }
 0x106   :  { %v333_v51 = vpop.f32.mrf.mxu0  ;;  %v404_v52 = vpop.f32.mrf.mxu1 }
 0x107   :  { %v334_v53 = vadd.f32 %v333_v51, %v220_v46  ;;  %v405_v54 = vadd.f32 %v404_v52, %v228_v47 }
 0x108   :  { %v335_v55 = vpop.f32.mrf.mxu0  ;;  %v406_v3 = vpop.f32.mrf.mxu1 }
 0x109   :  { %v336_v56 = vadd.f32 %v335_v55, %v224_v48  ;;  %v407_v58 = vadd.f32 %v406_v3, %v232_v50 }
 0x10b   :  { %v632_v59 = vcombine.low %v334_v53, %v336_v56  ;;  %v633_v60 = vcombine.low %v405_v54, %v407_v58 }
 0x10d   :  { %v640_v61 = vrot.slane %v632_v59, %v639_v57  ;;  %v647_v62 = vrot.slane %v633_v60, %v639_v57 }
 0x10f   :  { %v648_v63 = vcombine.low %v640_v61, %v647_v62 }
 0x111   :  { %677 = vst [vmem:[%s818_s3] sm:$0xff] %v648_v63 }
 0x128   :  { %v475_v10 = vpop.f32.mrf.mxu0  ;;  %v546_v11 = vpop.f32.mrf.mxu1 }
 0x129   :  { %v476_v12 = vadd.f32 %v475_v10, %v236_v6  ;;  %v547_v13 = vadd.f32 %v546_v11, %v244_v7 }
 0x12a   :  { %v477_v14 = vpop.f32.mrf.mxu0  ;;  %v548_v15 = vpop.f32.mrf.mxu1 }
 0x12b   :  { %v478_v16 = vadd.f32 %v477_v14, %v240_v8  ;;  %v549_v17 = vadd.f32 %v548_v15, %v248_v9 }
 0x12d   :  { %v649_v18 = vcombine.low %v476_v12, %v478_v16  ;;  %v650_v0 = vcombine.low %v547_v13, %v549_v17 }
 0x12f   :  { %v657_v19 = vrot.slane %v649_v18, %v639_v57  ;;  %v664_v20 = vrot.slane %v650_v0, %v639_v57 }
 0x131   :  { %v665_v21 = vcombine.low %v657_v19, %v664_v20 }
 0x133   :  { %678 = vst [vmem:[%s818_s3 + $0x8] sm:$0xff] %v665_v21 }
 0x149   :  { %v617_v25 = vpop.f32.mrf.mxu0 }
 0x14a   :  { %v618_v27 = vadd.f32 %v617_v25, %v252_v23 }
 0x14b   :  { %v619_v26 = vpop.f32.mrf.mxu0 }
 0x14c   :  { %v620_v28 = vadd.f32 %v619_v26, %v256_v24 }
 0x14e   :  { %v666_v29 = vcombine.low %v618_v27, %v620_v28 }
 0x150   :  { %686 = vst.sshfl [vmem:[%s818_s3 + $0x10] sm:$0x33 pattern:$0x76325410] %v666_v29 }
 0x151   :  { %684 = vsyncpa [#allocation3], 1 }
 0x152   :  { %685 = vsyncpa [#allocation5], 1 }

</bundles_post_ra>
